<compile_context>
chip_gen: v7x
topology: tpu7x:2x2x1
jax: 0.10.0
libtpu: 0.0.40
codegen_flags: <defaults>
</compile_context>

<pallas_src>
import math

import jax
import jax.numpy as jnp
from jax import lax
from jax.experimental import pallas as pl
from jax.experimental.pallas import tpu as pltpu

# ---- model hyper-parameters (small, consistent with the PyTorch module) ----
B = 2            # batch size
N = 8            # session / sequence length
H = 32           # hiddenSize
BN = B * N       # fused (batch * seq) rows
NUM_HEADS = 2    # nn.MultiheadAttention(num_heads=2)
HEAD_DIM = H // NUM_HEADS
STEP = 1         # opt.step
N_NODE = 50      # item vocabulary
LN_EPS = 1e-5
NEG_INF = -1e30  # additive mask value; keep scores/mask in f32 (would overflow bf16)

# ---- packed weight-slab layout (rows; every matrix chunk starts at a multiple of 8) ----
SLAB_LANES = 128
ROW_BE = 0       # (1, 2H)  fused edge bias [b_ein | b_eout]
ROW_BGI = 1      # (1, 3H)  fused GRU input-gate bias (b_ih + [b_iah|b_oah] @ w_ih.T)
ROW_BGH = 2      # (1, 3H)  b_hh
ROW_LNW = 3      # (1, H)
ROW_LNB = 4      # (1, H)
ROW_BQKV = 5     # (1, 3H)  in_proj bias, q part pre-scaled by 1/sqrt(head_dim)
ROW_BOUT = 6     # (1, H)   out_proj bias
ROW_WE = 8       # (H, 2H)  [w_ein.T | w_eout.T]
ROW_WIH = 40     # (2H, 3H) w_ih.T
ROW_WHH = 104    # (H, 3H)  w_hh.T
ROW_WQKV = 136   # (H, 3H)  in_proj_w.T, q columns pre-scaled
ROW_WO = 168     # (H, H)   out_proj_w.T
ROW_MASK = 200   # (BN, BN) session-causal additive mask
SLAB_ROWS = 216


def tagnn_kernel(data_ref, w_ref, o_ref):
    f32 = jnp.float32

    def mm(x, w):  # weights are pre-transposed host-side: plain x @ w on the MXU
        return jnp.dot(x, w, preferred_element_type=f32)

    # ---------------- per-call data slab ----------------
    h = data_ref[0:BN, :]                      # (BN, H)  embedded sessions, fused
    A_in = data_ref[BN:2 * BN, 0:BN]           # (BN, BN) block-diagonal incoming adjacency
    A_out = data_ref[2 * BN:3 * BN, 0:BN]      # (BN, BN) block-diagonal outgoing adjacency

    # ---------------- weight views (hoisted out of the STEP loop) ----------------
    w_e = w_ref[ROW_WE:ROW_WE + H, 0:2 * H]            # (H, 2H)
    b_e = w_ref[ROW_BE:ROW_BE + 1, 0:2 * H]            # (1, 2H)
    w_gi = w_ref[ROW_WIH:ROW_WIH + 2 * H, 0:3 * H]     # (2H, 3H)
    b_gi = w_ref[ROW_BGI:ROW_BGI + 1, 0:3 * H]         # (1, 3H)  (b_iah/b_oah folded in)
    w_gh = w_ref[ROW_WHH:ROW_WHH + H, 0:3 * H]         # (H, 3H)
    b_gh = w_ref[ROW_BGH:ROW_BGH + 1, 0:3 * H]         # (1, 3H)

    # ---------------- Attention_GNN (GRU-style cell), STEP iterations ----------------
    for _ in range(STEP):
        eh = mm(h, w_e) + b_e                           # (BN, 2H) = [edge_in(h) | edge_out(h)]
        input_in = mm(A_in, eh[:, :H])                  # (BN, H)
        input_out = mm(A_out, eh[:, H:])                # (BN, H)
        inp = jnp.concatenate([input_in, input_out], axis=-1)   # (BN, 2H)

        gi = mm(inp, w_gi) + b_gi                       # (BN, 3H): gates r|i|n fused on lanes
        gh = mm(h, w_gh) + b_gh                         # (BN, 3H)

        s_ri = gi + gh
        resetgate = jax.nn.sigmoid(s_ri[:, :H])
        inputgate = jax.nn.sigmoid(s_ri[:, H:2 * H])
        newgate = jnp.tanh(gi[:, 2 * H:] + resetgate * gh[:, 2 * H:])
        h = newgate + inputgate * (h - newgate)

    # ---------------- LayerNorm (skip branch) ----------------
    ln_w = w_ref[ROW_LNW:ROW_LNW + 1, 0:H]
    ln_b = w_ref[ROW_LNB:ROW_LNB + 1, 0:H]
    mean = jnp.mean(h, axis=-1, keepdims=True)
    var = jnp.mean(jnp.square(h - mean), axis=-1, keepdims=True)
    skip = (h - mean) * lax.rsqrt(var + LN_EPS) * ln_w + ln_b

    # ---------------- MultiheadAttention (q/k/v from the pre-LayerNorm h) ----------------
    # Additive mask = causal within each session, NEG_INF across sessions, so the whole
    # batch runs as one (BN, BN) attention with exact per-session semantics.
    # The 1/sqrt(head_dim) scale is pre-folded into the q weights/bias host-side.
    # TODO(synk): attention-weight dropout (p=0.1) omitted -- eval-mode semantics.
    w_qkv = w_ref[ROW_WQKV:ROW_WQKV + H, 0:3 * H]       # (H, 3H)
    b_qkv = w_ref[ROW_BQKV:ROW_BQKV + 1, 0:3 * H]       # (1, 3H)
    mask = w_ref[ROW_MASK:ROW_MASK + BN, 0:BN]          # (BN, BN)

    qkv = mm(h, w_qkv) + b_qkv                          # (BN, 3H): [q | k | v], both heads fused

    heads = []
    for a in range(NUM_HEADS):
        q = qkv[:, a * HEAD_DIM:(a + 1) * HEAD_DIM]
        k = qkv[:, H + a * HEAD_DIM:H + (a + 1) * HEAD_DIM]
        v = qkv[:, 2 * H + a * HEAD_DIM:2 * H + (a + 1) * HEAD_DIM]
        # q @ k^T without an in-kernel transpose: contract last dims of both operands.
        s = lax.dot_general(q, k, (((1,), (1,)), ((), ())),
                            preferred_element_type=f32) + mask
        s = s - jnp.max(s, axis=-1, keepdims=True)
        p = jnp.exp(s)
        p = p * pl.reciprocal(jnp.sum(p, axis=-1, keepdims=True), approx=True)
        heads.append(mm(p, v))                          # (BN, HEAD_DIM)

    heads_cat = jnp.concatenate(heads, axis=-1)         # (BN, H) -- one vreg, one out-projection
    w_o = w_ref[ROW_WO:ROW_WO + H, 0:H]
    b_o = w_ref[ROW_BOUT:ROW_BOUT + 1, 0:H]
    o_ref[...] = skip + mm(heads_cat, w_o) + b_o


def _full_spec(shape):
    nd = len(shape)
    return pl.BlockSpec(shape, lambda g, _nd=nd: (0,) * _nd)


def _block_diag(mats):
    """(B, N, N) per-session matrices -> (B*N, B*N) block-diagonal matrix (host-side)."""
    b, n, _ = mats.shape
    eye = jnp.eye(b, dtype=mats.dtype)
    return jnp.einsum("bij,bc->bicj", mats, eye).reshape(b * n, b * n)


def _session_causal_mask(batch, n):
    """Additive mask: 0 where key j may attend (same session, j <= i), else NEG_INF."""
    idx = jnp.arange(batch * n)
    same_session = (idx[:, None] // n) == (idx[None, :] // n)
    causal = idx[None, :] <= idx[:, None]
    return jnp.where(same_session & causal, 0.0, NEG_INF).astype(jnp.float32)


def prepare_params(params):
    """One-time host-side prep: fuse / transpose / bias-fold every weight and pack the
    whole parameter set (plus the static attention mask) into a single (216, 128) slab."""
    scale = 1.0 / math.sqrt(HEAD_DIM)

    w_ih_t = params["w_ih"].T                                              # (2H, 3H)
    w_e_fused = jnp.concatenate([params["w_ein"].T, params["w_eout"].T], axis=1)   # (H, 2H)
    b_e_fused = jnp.concatenate([params["b_ein"], params["b_eout"]])               # (2H,)
    # Fold b_iah / b_oah into the GRU input-gate bias (mathematically exact):
    b_gi_fused = params["b_ih"] + jnp.concatenate([params["b_iah"], params["b_oah"]]) @ w_ih_t
    w_hh_t = params["w_hh"].T                                              # (H, 3H)

    # MultiheadAttention: fused [q|k|v] projection with the 1/sqrt(head_dim) scale folded
    # into the q columns (exact; PyTorch scales q after projection).
    qkv_scale = jnp.concatenate([jnp.full((H,), scale, jnp.float32),
                                 jnp.ones((2 * H,), jnp.float32)])
    w_qkv = params["in_proj_w"].T * qkv_scale[None, :]                     # (H, 3H)
    b_qkv = params["in_proj_b"] * qkv_scale                                # (3H,)
    wo_t = params["out_proj_w"].T                                          # (H, H)
    mask = _session_causal_mask(B, N)                                      # (BN, BN)

    slab = jnp.zeros((SLAB_ROWS, SLAB_LANES), jnp.float32)

    def place(s, row, arr):
        arr = jnp.atleast_2d(arr).astype(jnp.float32)
        r, c = arr.shape
        return s.at[row:row + r, :c].set(arr)

    slab = place(slab, ROW_BE, b_e_fused)
    slab = place(slab, ROW_BGI, b_gi_fused)
    slab = place(slab, ROW_BGH, params["b_hh"])
    slab = place(slab, ROW_LNW, params["ln_w"])
    slab = place(slab, ROW_LNB, params["ln_b"])
    slab = place(slab, ROW_BQKV, b_qkv)
    slab = place(slab, ROW_BOUT, params["out_proj_b"])
    slab = place(slab, ROW_WE, w_e_fused)
    slab = place(slab, ROW_WIH, w_ih_t)
    slab = place(slab, ROW_WHH, w_hh_t)
    slab = place(slab, ROW_WQKV, w_qkv)
    slab = place(slab, ROW_WO, wo_t)
    slab = place(slab, ROW_MASK, mask)

    return {"embedding": params["embedding"], "wslab": slab}


def attention_session_graph_forward(inputs, A, prep):
    batch, n = inputs.shape
    bn = batch * n

    # Glue (plain JAX, outside the kernel): embedding lookup, batch flattening,
    # block-diagonal adjacency, and packing of the per-call data slab.
    # TODO(synk): the embedding gather could be folded into the kernel via scalar
    # prefetch of `inputs`; kept host-side for robustness (marginal at this size).
    emb = jnp.take(prep["embedding"], inputs.reshape(-1), axis=0).astype(jnp.float32)  # (bn, H)
    a_in_bd = _block_diag(A[:, :, :n]).astype(jnp.float32)        # (bn, bn)
    a_out_bd = _block_diag(A[:, :, n:]).astype(jnp.float32)       # (bn, bn)
    pad = H - bn                                                  # bn(=16) <= H(=32) at these shapes
    data = jnp.concatenate([
        emb,
        jnp.pad(a_in_bd, ((0, 0), (0, pad))),
        jnp.pad(a_out_bd, ((0, 0), (0, pad))),
    ], axis=0)                                                    # (3*bn, H) = (48, 32)

    wslab = prep["wslab"]

    flops = STEP * (2 * bn * H * 2 * H            # fused edge projection
                    + 2 * 2 * bn * bn * H         # A_in / A_out matmuls
                    + 2 * bn * 2 * H * 3 * H      # fused input-gate projection
                    + 2 * bn * H * 3 * H)         # fused hidden-gate projection
    flops += (2 * bn * H * 3 * H                  # fused q|k|v projection
              + NUM_HEADS * 2 * 2 * bn * bn * HEAD_DIM
              + 2 * bn * H * H)                   # out-projection
    transcendentals = STEP * 3 * bn * H + NUM_HEADS * bn * bn + (NUM_HEADS + 1) * bn
    bytes_accessed = 4 * (int(data.size) + int(wslab.size) + bn * H)

    out_flat = pl.pallas_call(
        tagnn_kernel,
        out_shape=jax.ShapeDtypeStruct((bn, H), jnp.float32),
        # Single program: per-grid-step overhead dominates at these shapes, so all
        # sessions are fused into one slab and the whole call is two prologue DMAs.
        # (On v7x a "parallel" session axis over the two TensorCores could be
        # reintroduced for larger batch; no benefit at B=2.)
        grid=(1,),
        in_specs=[_full_spec(data.shape), _full_spec(wslab.shape)],
        out_specs=_full_spec((bn, H)),
        compiler_params=pltpu.CompilerParams(dimension_semantics=("arbitrary",)),
        cost_estimate=pl.CostEstimate(flops=flops,
                                      transcendentals=transcendentals,
                                      bytes_accessed=bytes_accessed),
    )(data, wslab)

    return out_flat.reshape(batch, n, H)


def init_params(key):
    """reset_parameters(): every parameter ~ U(-stdv, stdv) with stdv = 1/sqrt(H)."""
    stdv = 1.0 / math.sqrt(H)

    def u(k, shape):
        return jax.random.uniform(k, shape, jnp.float32, minval=-stdv, maxval=stdv)

    shapes = {
        "embedding": (N_NODE, H),
        "w_ein": (H, H), "b_ein": (H,),
        "w_eout": (H, H), "b_eout": (H,),
        "b_iah": (H,), "b_oah": (H,),
        "w_ih": (3 * H, 2 * H), "b_ih": (3 * H,),
        "w_hh": (3 * H, H), "b_hh": (3 * H,),
        "ln_w": (H,), "ln_b": (H,),
        "in_proj_w": (3 * H, H), "in_proj_b": (3 * H,),
        "out_proj_w": (H, H), "out_proj_b": (H,),
    }
    keys = jax.random.split(key, len(shapes))
    return {name: u(k, shape) for (name, shape), k in zip(shapes.items(), keys)}


if __name__ == "__main__":
    key = jax.random.PRNGKey(0)
    pkey, ikey, akey = jax.random.split(key, 3)

    params = init_params(pkey)
    prep = prepare_params(params)

    inputs = jax.random.randint(ikey, (B, N), minval=1, maxval=N_NODE, dtype=jnp.int32)
    A = jax.random.uniform(akey, (B, N, 2 * N), dtype=jnp.float32)  # session adjacency (in | out)

    fwd = jax.jit(attention_session_graph_forward)
    out = fwd(inputs, A, prep)
    out = jax.block_until_ready(out)
    assert out.shape == (B, N, H) and out.dtype == jnp.float32
    print("KERNEL_OK")
</pallas_src>

<mosaic_0001>
module attributes {stable_mosaic.version = 11 : i64} {
  func.func @tagnn_kernel(%arg0: i32, %arg1: memref<48x32xf32, #tpu.memory_space<vmem>>, %arg2: memref<216x128xf32, #tpu.memory_space<vmem>>, %arg3: memref<16x32xf32, #tpu.memory_space<vmem>>) attributes {dimension_semantics = [#tpu.dimension_semantics<arbitrary>], iteration_bounds = array<i64: 1>, scalar_prefetch = 0 : i64, scratch_operands = 0 : i64, tpu.core_type = #tpu.core_type<tc>, window_params = [{pipeline_mode = #tpu.pipeline_mode<synchronous>, transform_indices = @transform_0, window_bounds = array<i64: 48, 32>}, {pipeline_mode = #tpu.pipeline_mode<synchronous>, transform_indices = @transform_1, window_bounds = array<i64: 216, 128>}, {pipeline_mode = #tpu.pipeline_mode<synchronous>, transform_indices = @transform_2, window_bounds = array<i64: 16, 32>}]} {
    %c0 = arith.constant 0 : index
    %c0_0 = arith.constant 0 : index
    %0 = vector.load %arg1[%c0, %c0_0] : memref<48x32xf32, #tpu.memory_space<vmem>>, vector<16x32xf32>
    %c16 = arith.constant 16 : index
    %c0_1 = arith.constant 0 : index
    %1 = vector.load %arg1[%c16, %c0_1] : memref<48x32xf32, #tpu.memory_space<vmem>>, vector<16x16xf32>
    %c32 = arith.constant 32 : index
    %c0_2 = arith.constant 0 : index
    %2 = vector.load %arg1[%c32, %c0_2] : memref<48x32xf32, #tpu.memory_space<vmem>>, vector<16x16xf32>
    %c8 = arith.constant 8 : index
    %c0_3 = arith.constant 0 : index
    %3 = vector.load %arg2[%c8, %c0_3] : memref<216x128xf32, #tpu.memory_space<vmem>>, vector<32x64xf32>
    %c0_4 = arith.constant 0 : index
    %c0_5 = arith.constant 0 : index
    %4 = vector.load %arg2[%c0_4, %c0_5] : memref<216x128xf32, #tpu.memory_space<vmem>>, vector<1x64xf32>
    %c40 = arith.constant 40 : index
    %c0_6 = arith.constant 0 : index
    %5 = vector.load %arg2[%c40, %c0_6] : memref<216x128xf32, #tpu.memory_space<vmem>>, vector<64x96xf32>
    %c1 = arith.constant 1 : index
    %c0_7 = arith.constant 0 : index
    %6 = vector.load %arg2[%c1, %c0_7] : memref<216x128xf32, #tpu.memory_space<vmem>>, vector<1x96xf32>
    %c104 = arith.constant 104 : index
    %c0_8 = arith.constant 0 : index
    %7 = vector.load %arg2[%c104, %c0_8] : memref<216x128xf32, #tpu.memory_space<vmem>>, vector<32x96xf32>
    %c2 = arith.constant 2 : index
    %c0_9 = arith.constant 0 : index
    %8 = vector.load %arg2[%c2, %c0_9] : memref<216x128xf32, #tpu.memory_space<vmem>>, vector<1x96xf32>
    %cst = arith.constant dense<0.000000e+00> : vector<16x64xf32>
    %9 = tpu.matmul %0, %3, %cst {dimension_numbers = #tpu.dot_dimension_numbers<[1], [0], [0], [1], [0, 0, 1, 1], [], []>} : vector<16x32xf32>, vector<32x64xf32>, vector<16x64xf32> -> vector<16x64xf32>
    %10 = vector.broadcast %4 : vector<1x64xf32> to vector<16x64xf32>
    %11 = arith.addf %9, %10 : vector<16x64xf32>
    %12 = vector.extract_strided_slice %11 {offsets = [0, 0], sizes = [16, 32], strides = [1, 1]} : vector<16x64xf32> to vector<16x32xf32>
    %cst_10 = arith.constant dense<0.000000e+00> : vector<16x32xf32>
    %13 = tpu.matmul %1, %12, %cst_10 {dimension_numbers = #tpu.dot_dimension_numbers<[1], [0], [0], [1], [0, 0, 1, 1], [], []>} : vector<16x16xf32>, vector<16x32xf32>, vector<16x32xf32> -> vector<16x32xf32>
    %14 = vector.extract_strided_slice %11 {offsets = [0, 32], sizes = [16, 32], strides = [1, 1]} : vector<16x64xf32> to vector<16x32xf32>
    %cst_11 = arith.constant dense<0.000000e+00> : vector<16x32xf32>
    %15 = tpu.matmul %2, %14, %cst_11 {dimension_numbers = #tpu.dot_dimension_numbers<[1], [0], [0], [1], [0, 0, 1, 1], [], []>} : vector<16x16xf32>, vector<16x32xf32>, vector<16x32xf32> -> vector<16x32xf32>
    %16 = tpu.concatenate %13, %15 in 1 : vector<16x32xf32>, vector<16x32xf32> -> vector<16x64xf32>
    %cst_12 = arith.constant dense<0.000000e+00> : vector<16x96xf32>
    %17 = tpu.matmul %16, %5, %cst_12 {dimension_numbers = #tpu.dot_dimension_numbers<[1], [0], [0], [1], [0, 0, 1, 1], [], []>} : vector<16x64xf32>, vector<64x96xf32>, vector<16x96xf32> -> vector<16x96xf32>
    %18 = vector.broadcast %6 : vector<1x96xf32> to vector<16x96xf32>
    %19 = arith.addf %17, %18 : vector<16x96xf32>
    %cst_13 = arith.constant dense<0.000000e+00> : vector<16x96xf32>
    %20 = tpu.matmul %0, %7, %cst_13 {dimension_numbers = #tpu.dot_dimension_numbers<[1], [0], [0], [1], [0, 0, 1, 1], [], []>} : vector<16x32xf32>, vector<32x96xf32>, vector<16x96xf32> -> vector<16x96xf32>
    %21 = vector.broadcast %8 : vector<1x96xf32> to vector<16x96xf32>
    %22 = arith.addf %20, %21 : vector<16x96xf32>
    %23 = arith.addf %19, %22 : vector<16x96xf32>
    %24 = vector.extract_strided_slice %23 {offsets = [0, 0], sizes = [16, 32], strides = [1, 1]} : vector<16x96xf32> to vector<16x32xf32>
    %25 = arith.negf %24 : vector<16x32xf32>
    %26 = math.exp %25 : vector<16x32xf32>
    %cst_14 = arith.constant 1.000000e+00 : f32
    %27 = vector.broadcast %cst_14 : f32 to vector<16x32xf32>
    %28 = arith.addf %27, %26 : vector<16x32xf32>
    %29 = arith.divf %27, %28 : vector<16x32xf32>
    %30 = vector.extract_strided_slice %23 {offsets = [0, 32], sizes = [16, 32], strides = [1, 1]} : vector<16x96xf32> to vector<16x32xf32>
    %31 = arith.negf %30 : vector<16x32xf32>
    %32 = math.exp %31 : vector<16x32xf32>
    %cst_15 = arith.constant 1.000000e+00 : f32
    %33 = vector.broadcast %cst_15 : f32 to vector<16x32xf32>
    %34 = arith.addf %33, %32 : vector<16x32xf32>
    %35 = arith.divf %33, %34 : vector<16x32xf32>
    %36 = vector.extract_strided_slice %19 {offsets = [0, 64], sizes = [16, 32], strides = [1, 1]} : vector<16x96xf32> to vector<16x32xf32>
    %37 = vector.extract_strided_slice %22 {offsets = [0, 64], sizes = [16, 32], strides = [1, 1]} : vector<16x96xf32> to vector<16x32xf32>
    %38 = arith.mulf %29, %37 : vector<16x32xf32>
    %39 = arith.addf %36, %38 : vector<16x32xf32>
    %40 = math.tanh %39 : vector<16x32xf32>
    %41 = arith.subf %0, %40 : vector<16x32xf32>
    %42 = arith.mulf %35, %41 : vector<16x32xf32>
    %43 = arith.addf %40, %42 : vector<16x32xf32>
    %c3 = arith.constant 3 : index
    %c0_16 = arith.constant 0 : index
    %44 = vector.load %arg2[%c3, %c0_16] : memref<216x128xf32, #tpu.memory_space<vmem>>, vector<1x32xf32>
    %c4 = arith.constant 4 : index
    %c0_17 = arith.constant 0 : index
    %45 = vector.load %arg2[%c4, %c0_17] : memref<216x128xf32, #tpu.memory_space<vmem>>, vector<1x32xf32>
    %cst_18 = arith.constant dense<0.000000e+00> : vector<16xf32>
    %46 = vector.multi_reduction <add>, %43, %cst_18 [1] : vector<16x32xf32> to vector<16xf32>
    %47 = vector.shape_cast %46 : vector<16xf32> to vector<16x1xf32>
    %cst_19 = arith.constant 3.200000e+01 : f32
    %48 = vector.broadcast %cst_19 : f32 to vector<16x1xf32>
    %49 = arith.divf %47, %48 : vector<16x1xf32>
    %50 = vector.broadcast %49 : vector<16x1xf32> to vector<16x32xf32>
    %51 = arith.subf %43, %50 : vector<16x32xf32>
    %52 = arith.mulf %51, %51 : vector<16x32xf32>
    %cst_20 = arith.constant dense<0.000000e+00> : vector<16xf32>
    %53 = vector.multi_reduction <add>, %52, %cst_20 [1] : vector<16x32xf32> to vector<16xf32>
    %54 = vector.shape_cast %53 : vector<16xf32> to vector<16x1xf32>
    %cst_21 = arith.constant 3.200000e+01 : f32
    %55 = vector.broadcast %cst_21 : f32 to vector<16x1xf32>
    %56 = arith.divf %54, %55 : vector<16x1xf32>
    %57 = vector.broadcast %49 : vector<16x1xf32> to vector<16x32xf32>
    %58 = arith.subf %43, %57 : vector<16x32xf32>
    %cst_22 = arith.constant 9.99999974E-6 : f32
    %59 = vector.broadcast %cst_22 : f32 to vector<16x1xf32>
    %60 = arith.addf %56, %59 : vector<16x1xf32>
    %61 = math.rsqrt %60 : vector<16x1xf32>
    %62 = vector.broadcast %61 : vector<16x1xf32> to vector<16x32xf32>
    %63 = arith.mulf %58, %62 : vector<16x32xf32>
    %64 = vector.broadcast %44 : vector<1x32xf32> to vector<16x32xf32>
    %65 = arith.mulf %63, %64 : vector<16x32xf32>
    %66 = vector.broadcast %45 : vector<1x32xf32> to vector<16x32xf32>
    %67 = arith.addf %65, %66 : vector<16x32xf32>
    %c136 = arith.constant 136 : index
    %c0_23 = arith.constant 0 : index
    %68 = vector.load %arg2[%c136, %c0_23] : memref<216x128xf32, #tpu.memory_space<vmem>>, vector<32x96xf32>
    %c5 = arith.constant 5 : index
    %c0_24 = arith.constant 0 : index
    %69 = vector.load %arg2[%c5, %c0_24] : memref<216x128xf32, #tpu.memory_space<vmem>>, vector<1x96xf32>
    %c200 = arith.constant 200 : index
    %c0_25 = arith.constant 0 : index
    %70 = vector.load %arg2[%c200, %c0_25] : memref<216x128xf32, #tpu.memory_space<vmem>>, vector<16x16xf32>
    %cst_26 = arith.constant dense<0.000000e+00> : vector<16x96xf32>
    %71 = tpu.matmul %43, %68, %cst_26 {dimension_numbers = #tpu.dot_dimension_numbers<[1], [0], [0], [1], [0, 0, 1, 1], [], []>} : vector<16x32xf32>, vector<32x96xf32>, vector<16x96xf32> -> vector<16x96xf32>
    %72 = vector.broadcast %69 : vector<1x96xf32> to vector<16x96xf32>
    %73 = arith.addf %71, %72 : vector<16x96xf32>
    %74 = vector.extract_strided_slice %73 {offsets = [0, 0], sizes = [16, 16], strides = [1, 1]} : vector<16x96xf32> to vector<16x16xf32>
    %75 = vector.extract_strided_slice %73 {offsets = [0, 32], sizes = [16, 16], strides = [1, 1]} : vector<16x96xf32> to vector<16x16xf32>
    %76 = vector.extract_strided_slice %73 {offsets = [0, 64], sizes = [16, 16], strides = [1, 1]} : vector<16x96xf32> to vector<16x16xf32>
    %cst_27 = arith.constant dense<0.000000e+00> : vector<16x16xf32>
    %77 = tpu.matmul %74, %75, %cst_27 {dimension_numbers = #tpu.dot_dimension_numbers<[1], [1], [0], [0], [0, 0, 1, 0], [], []>} : vector<16x16xf32>, vector<16x16xf32>, vector<16x16xf32> -> vector<16x16xf32>
    %78 = arith.addf %77, %70 : vector<16x16xf32>
    %cst_28 = arith.constant dense<0xFF800000> : vector<16xf32>
    %79 = vector.multi_reduction <maximumf>, %78, %cst_28 [1] : vector<16x16xf32> to vector<16xf32>
    %80 = vector.shape_cast %79 : vector<16xf32> to vector<16x1xf32>
    %81 = vector.broadcast %80 : vector<16x1xf32> to vector<16x16xf32>
    %82 = arith.subf %78, %81 : vector<16x16xf32>
    %83 = math.exp %82 : vector<16x16xf32>
    %cst_29 = arith.constant dense<0.000000e+00> : vector<16xf32>
    %84 = vector.multi_reduction <add>, %83, %cst_29 [1] : vector<16x16xf32> to vector<16xf32>
    %85 = vector.shape_cast %84 : vector<16xf32> to vector<16x1xf32>
    %86 = tpu.reciprocal %85 {approx = true} : vector<16x1xf32> -> vector<16x1xf32>
    %87 = vector.broadcast %86 : vector<16x1xf32> to vector<16x16xf32>
    %88 = arith.mulf %83, %87 : vector<16x16xf32>
    %cst_30 = arith.constant dense<0.000000e+00> : vector<16x16xf32>
    %89 = tpu.matmul %88, %76, %cst_30 {dimension_numbers = #tpu.dot_dimension_numbers<[1], [0], [0], [1], [0, 0, 1, 1], [], []>} : vector<16x16xf32>, vector<16x16xf32>, vector<16x16xf32> -> vector<16x16xf32>
    %90 = vector.extract_strided_slice %73 {offsets = [0, 16], sizes = [16, 16], strides = [1, 1]} : vector<16x96xf32> to vector<16x16xf32>
    %91 = vector.extract_strided_slice %73 {offsets = [0, 48], sizes = [16, 16], strides = [1, 1]} : vector<16x96xf32> to vector<16x16xf32>
    %92 = vector.extract_strided_slice %73 {offsets = [0, 80], sizes = [16, 16], strides = [1, 1]} : vector<16x96xf32> to vector<16x16xf32>
    %cst_31 = arith.constant dense<0.000000e+00> : vector<16x16xf32>
    %93 = tpu.matmul %90, %91, %cst_31 {dimension_numbers = #tpu.dot_dimension_numbers<[1], [1], [0], [0], [0, 0, 1, 0], [], []>} : vector<16x16xf32>, vector<16x16xf32>, vector<16x16xf32> -> vector<16x16xf32>
    %94 = arith.addf %93, %70 : vector<16x16xf32>
    %cst_32 = arith.constant dense<0xFF800000> : vector<16xf32>
    %95 = vector.multi_reduction <maximumf>, %94, %cst_32 [1] : vector<16x16xf32> to vector<16xf32>
    %96 = vector.shape_cast %95 : vector<16xf32> to vector<16x1xf32>
    %97 = vector.broadcast %96 : vector<16x1xf32> to vector<16x16xf32>
    %98 = arith.subf %94, %97 : vector<16x16xf32>
    %99 = math.exp %98 : vector<16x16xf32>
    %cst_33 = arith.constant dense<0.000000e+00> : vector<16xf32>
    %100 = vector.multi_reduction <add>, %99, %cst_33 [1] : vector<16x16xf32> to vector<16xf32>
    %101 = vector.shape_cast %100 : vector<16xf32> to vector<16x1xf32>
    %102 = tpu.reciprocal %101 {approx = true} : vector<16x1xf32> -> vector<16x1xf32>
    %103 = vector.broadcast %102 : vector<16x1xf32> to vector<16x16xf32>
    %104 = arith.mulf %99, %103 : vector<16x16xf32>
    %cst_34 = arith.constant dense<0.000000e+00> : vector<16x16xf32>
    %105 = tpu.matmul %104, %92, %cst_34 {dimension_numbers = #tpu.dot_dimension_numbers<[1], [0], [0], [1], [0, 0, 1, 1], [], []>} : vector<16x16xf32>, vector<16x16xf32>, vector<16x16xf32> -> vector<16x16xf32>
    %106 = tpu.concatenate %89, %105 in 1 : vector<16x16xf32>, vector<16x16xf32> -> vector<16x32xf32>
    %c168 = arith.constant 168 : index
    %c0_35 = arith.constant 0 : index
    %107 = vector.load %arg2[%c168, %c0_35] : memref<216x128xf32, #tpu.memory_space<vmem>>, vector<32x32xf32>
    %c6 = arith.constant 6 : index
    %c0_36 = arith.constant 0 : index
    %108 = vector.load %arg2[%c6, %c0_36] : memref<216x128xf32, #tpu.memory_space<vmem>>, vector<1x32xf32>
    %cst_37 = arith.constant dense<0.000000e+00> : vector<16x32xf32>
    %109 = tpu.matmul %106, %107, %cst_37 {dimension_numbers = #tpu.dot_dimension_numbers<[1], [0], [0], [1], [0, 0, 1, 1], [], []>} : vector<16x32xf32>, vector<32x32xf32>, vector<16x32xf32> -> vector<16x32xf32>
    %110 = arith.addf %67, %109 : vector<16x32xf32>
    %111 = vector.broadcast %108 : vector<1x32xf32> to vector<16x32xf32>
    %112 = arith.addf %110, %111 : vector<16x32xf32>
    %c0_38 = arith.constant 0 : index
    %c0_39 = arith.constant 0 : index
    %113 = vector.load %arg3[%c0_38, %c0_39] : memref<16x32xf32, #tpu.memory_space<vmem>>, vector<16x32xf32>
    tpu.vector_store %arg3[%c0_38, %c0_39], %112 {strides = array<i32>} : memref<16x32xf32, #tpu.memory_space<vmem>>, vector<16x32xf32>,
    return
  }
  func.func @transform_0(%arg0: i32) -> (i32, i32) {
    %c0_i32 = arith.constant 0 : i32
    %c0_i32_0 = arith.constant 0 : i32
    %c0_i32_1 = arith.constant 0 : i32
    return %c0_i32, %c0_i32_0 : i32, i32
  }
  func.func @transform_1(%arg0: i32) -> (i32, i32) {
    %c0_i32 = arith.constant 0 : i32
    %c0_i32_0 = arith.constant 0 : i32
    %c0_i32_1 = arith.constant 0 : i32
    return %c0_i32, %c0_i32_0 : i32, i32
  }
  func.func @transform_2(%arg0: i32) -> (i32, i32) {
    %c0_i32 = arith.constant 0 : i32
    %c0_i32_0 = arith.constant 0 : i32
    %c0_i32_1 = arith.constant 0 : i32
    return %c0_i32, %c0_i32_0 : i32, i32
  }
}

</mosaic_0001>

<bundles_post_ra>
// kernel: attention_session_graph_forward.1
= control target key start
LH: loop header
LB: loop body
LE: loop exit
PB: predicated region body
PF: predicated region fallthrough
CT: control target
= control target key end

     0   :  { %vm41_vm0 = vcmask 261120   ;;  %s1865_s0 = inlined_call_operand.vmem [shape: f32[48,32], index: 0, kind: input, shape index: {}]   ;;  %s1866_s1 = inlined_call_operand.vmem [shape: f32[216,128], index: 1, kind: input, shape index: {}]   ;;  %s1867_s2 = inlined_call_operand.hbm [shape: f32[16,32], index: 2, kind: output, shape index: {}]  }
   0x1   :  { %v18_v0 = vld [vmem:[%s1866_s1 + $0x8] sm:$0xff]  ;;  %v19_v1 = vld [vmem:[%s1866_s1 + $0x10] sm:$0xff]  ;;  %v20_v2 = vld [vmem:[%s1866_s1 + $0x18] sm:$0xff] }
   0x2   :  { %v1428_v3 = vpack.c.bf16 %v19_v1, %v18_v0  ;;  %v21_v4 = vld [vmem:[%s1866_s1 + $0x20] sm:$0xff] }
   0x3   :  { %v1635_v5 = vld [vmem:[%s1865_s0] sm:$0xff]  ;;  %v1432_v6 = vpack.c.bf16 %v21_v4, %v20_v2 }
   0x4   :  { %1331 = vmatprep.mubr.msk.f32.mxu0 %vm41_vm0, %v1635_v5 }
   0x5   :  { %7 = vsyncpa [#allocation3], 0  ;;  %1429 = vmatprep.subr.bf16.mxu0 %v1428_v3  ;;  %v1642_v7 = vld [vmem:[%s1865_s0 + $0x8] sm:$0xff]  ;;  %v14_v8 = vld [vmem:[%s1865_s0 + $0x10] sm:$0xff]  ;;  %vm123_vm1 = vcmask 130048   ;;  %s1595_s25 = smov 96  }
   0x6   :  { %1431 = vmatpush3.bf16.msra.mxu0 %v1428_v3  ;;  %1338 = vmatprep.mubr.msk.f32.mxu1 %vm123_vm1, %v14_v8  ;;  %v1230_v9 = vld [vmem:[%s1866_s1] ss:$0 sm:$0xff]  ;;  %v15_v16 = vld [vmem:[%s1865_s0 + $0x18] sm:$0xff]  ;;  %v17_v22 = vld [vmem:[%s1865_s0 + $0x28] sm:$0xff]  ;;  %s1596_s28 = smov 32   ;;  %s1597_s3 = smov 64  }
   0x7   :  { %1433 = vmatprep.subr.bf16.mxu0 %v1432_v6  ;;  %v16_v17 = vld [vmem:[%s1865_s0 + $0x20] sm:$0xff]  ;;  %v32_v23 = vld [vmem:[%s1866_s1 + $0x68] sm:$0xff]  ;;  %v33_v24 = vld [vmem:[%s1866_s1 + $0x70] sm:$0xff]  ;;  %vm308_vm2 = vcmask 523264   ;;  %s1598_s18 = smov 112   ;;  %s1599_s19 = smov 80  }
   0x8   :  { %v34_v25 = vld [vmem:[%s1866_s1 + $0x78] sm:$0xff]  ;;  %v1460_v26 = vpack.c.bf16 %v33_v24, %v32_v23  ;;  %v35_v27 = vld [vmem:[%s1866_s1 + $0x80] sm:$0xff]  ;;  %v23_v28 = vld [vmem:[%s1866_s1 + $0x28] sm:$0xff]  ;;  %s1600_s20 = smov 48   ;;  %s1601_s30 = smov 16  }
   0x9   :  { %v24_v29 = vld [vmem:[%s1866_s1 + $0x30] sm:$0xff]  ;;  %v1464_v30 = vpack.c.bf16 %v35_v27, %v34_v25  ;;  %v25_v32 = vld [vmem:[%s1866_s1 + $0x38] sm:$0xff]  ;;  %v26_v33 = vld [vmem:[%s1866_s1 + $0x40] sm:$0xff] }
   0xa   :  { %1435 = vmatpush3.bf16.msra.mxu0 %v1432_v6  ;;  %v1444_v31 = vpack.c.bf16 %v24_v29, %v23_v28  ;;  %v1448_v34 = vpack.c.bf16 %v26_v33, %v25_v32  ;;  %v27_v35 = vld [vmem:[%s1866_s1 + $0x48] sm:$0xff]  ;;  %v28_v36 = vld [vmem:[%s1866_s1 + $0x50] sm:$0xff]  ;;  %v29_v39 = vld [vmem:[%s1866_s1 + $0x58] sm:$0xff] }
   0xb   :  { %v1452_v37 = vpack.c.bf16 %v28_v36, %v27_v35  ;;  %v30_v40 = vld [vmem:[%s1866_s1 + $0x60] sm:$0xff]  ;;  %v602_v23 = vld [vmem:[%s1866_s1 + $0x98] sm:$0xff]  ;;  %vm1766_vm3 = vmpackc.low %vm123_vm1, %vm123_vm1 }
   0xc   :  { %1445 = vmatprep.subr.bf16.mxu0 %v1444_v31  ;;  %v1456_v42 = vpack.c.bf16 %v30_v40, %v29_v39  ;;  %v1240_v45 = vld [vmem:[%s1866_s1 + $0x2] ss:$0 sm:$0xff]  ;;  %v1237_v54 = vld [vmem:[%s1866_s1 + $0x1] ss:$0 sm:$0xff]  ;;  %v1247_v35 = vld [vmem:[%s1866_s1 + $0x5] ss:$0 sm:$0xff] }
   0xd   :  { %1332 = vmatmul.mubr.msk.f32.vlgmr.msra.gmra.mrb[0].mxu0 %vm41_vm0, %v1642_v7 }
   0xe   :  { %1447 = vmatpush3.bf16.msra.mxu0 %v1444_v31 }
   0xf   :  { %1449 = vmatprep.subr.bf16.mxu0 %v1448_v34 }
  0x12   :  { %1451 = vmatpush3.bf16.msra.mxu0 %v1448_v34 }
  0x13   :  { %1453 = vmatprep.subr.bf16.mxu0 %v1452_v37 }
  0x16   :  { %1455 = vmatpush3.bf16.msra.mxu0 %v1452_v37 }
  0x17   :  { %1457 = vmatprep.subr.bf16.mxu0 %v1456_v42 }
  0x1a   :  { %1459 = vmatpush3.bf16.msra.mxu0 %v1456_v42 }
  0xe0   :  { %v1333_v10 = vpop.f32.mrb[0].mxu0 }
  0xe1   :  { %v120_v11 = vadd.f32 %v1333_v10, %v1230_v9  ;;  %v114_v12 = vpop.f32.mrb[1].mxu0 }
  0xe2   :  { %v115_v13 = vadd.f32 %v1230_v9, %v114_v12 }
  0xe4   :  { %v1514_v14 = vpack.i.bf16 %v120_v11, %v115_v13  ;;  %v1436_v15 = vpack.c.bf16 %v120_v11, %v115_v13 }
  0xe6   :  { %1515 = vrot.lane.b32.xlu0 %v1514_v14, %s1595_s25  ;;  %1437 = vmatprep.subr.bf16.mxu1 %v1436_v15 }
  0xe7   :  { %1439 = vmatpush3.bf16.msra.mxu1 %v1436_v15 }
  0xea   :  { %1339 = vmatmul.mubr.msk.f32.vlgmr.msra.gmra.mrb[0].mxu1 %vm123_vm1, %v15_v16 }
  0xeb   :  { %1345 = vmatprep.mubr.msk.f32.mxu1 %vm123_vm1, %v16_v17 }
 0x158   :  { %v1516_v18 = vpop.permute.xlu0 %1515 }
 0x159   :  { %v1518_v19 = vunpack.i.h.bf16 %v1516_v18  ;;  %v1517_v20 = vunpack.i.l.bf16 %v1516_v18 }
 0x15b   :  { %v1440_v21 = vpack.c.bf16 %v1518_v19, %v1517_v20 }
 0x15d   :  { %1441 = vmatprep.subr.bf16.mxu1 %v1440_v21 }
 0x15e   :  { %1443 = vmatpush3.bf16.msra.mxu1 %v1440_v21  ;;  %v600_v21 = vld [vmem:[%s1866_s1 + $0x88] sm:$0xff] }
 0x15f   :  { %1461 = vmatprep.subr.bf16.mxu1 %v1460_v26 }
 0x161   :  { %1346 = vmatmul.mubr.msk.f32.vlgmr.msra.gmra.mrb[2].mxu1 %vm123_vm1, %v17_v22  ;;  %v601_v22 = vld [vmem:[%s1866_s1 + $0x90] sm:$0xff] }
 0x162   :  { %1375 = vmatprep.mubr.msk.f32.mxu1 %vm41_vm0, %v1635_v5  ;;  %1463 = vmatpush3.bf16.msra.mxu1 %v1460_v26 }
 0x163   :  { %1465 = vmatprep.subr.bf16.mxu1 %v1464_v30 }
 0x166   :  { %1467 = vmatpush3.bf16.msra.mxu1 %v1464_v30 }
 0x169   :  { %1376 = vmatmul.mubr.msk.f32.vlgmr.msra.gmra.mrb[4].mxu1 %vm41_vm0, %v1642_v7 }
 0x1bd   :  { %v1340_v38 = vpop.f32.mrb[0].mxu1 }
 0x1be   :  { %v196_v41 = vpop.f32.mrb[1].mxu1 }
 0x234   :  { %v1347_v43 = vpop.f32.mrb[2].mxu1 }
 0x235   :  { %298 = vrot.lane.b32.xlu1 %v1347_v43, %s1596_s28  ;;  %v285_v44 = vpop.f32.mrb[3].mxu1 }
 0x236   :  { %296 = vrot.lane.b32.xlu0 %v285_v44, %s1596_s28 }
 0x23c   :  { %v1377_v46 = vpop.f32.mrb[4].mxu1 }
 0x23d   :  { %v466_v47 = vadd.f32 %v1377_v46, %v1240_v45  ;;  %v460_v48 = vpop.f32.mrb[5].mxu1  ;;  %v606_v46 = vld [vmem:[%s1866_s1 + $0xd0] sm:$0xff] }
 0x23e   :  { %v461_v49 = vadd.f32 %v1240_v45, %v460_v48 }
 0x23f   :  { %487 = vrot.lane.b32.xlu0 %v466_v47, %s1597_s3 }
 0x240   :  { %485 = vrot.lane.b32.xlu1 %v461_v49, %s1597_s3 }
 0x2a7   :  { %v299_v50 = vpop.permute.xlu1 %298 }
 0x2a8   :  { %v297_v51 = vpop.permute.xlu0 %296  ;;  %v303_v53 = vsel %vm41_vm0, %v1340_v38, %v299_v50 }
 0x2a9   :  { %v302_v52 = vsel %vm41_vm0, %v196_v41, %v297_v51 }
 0x2aa   :  { %1364 = vmatprep.mubr.msk.f32.mxu0 %vm308_vm2, %v302_v52 }
 0x2ab   :  { %1365 = vmatmul.mubr.msk.f32.vlgmr.msra.gmra.mrb[2].mxu0 %vm308_vm2, %v303_v53 }
 0x2b1   :  { %v488_v3 = vpop.permute.xlu0 %487 }
 0x2b2   :  { %v486_v4 = vpop.permute.xlu1 %485 }
 0x37e   :  { %v1366_v55 = vpop.f32.mrb[2].mxu0 }
 0x37f   :  { %v387_v56 = vadd.f32 %v1366_v55, %v1237_v54  ;;  %v381_v57 = vpop.f32.mrb[3].mxu0 }
 0x380   :  { %v382_v58 = vadd.f32 %v1237_v54, %v381_v57 }
 0x381   :  { %v470_v59 = vadd.f32 %v466_v47, %v387_v56  ;;  %v605_v47 = vld [vmem:[%s1866_s1 + $0xc8] sm:$0xff] }
 0x382   :  { %v469_v60 = vadd.f32 %v461_v49, %v382_v58 }
 0x383   :  { %v1244_v61 = vmul.f32 -1.442695, %v470_v59 }
 0x384   :  { %v1243_v62 = vmul.f32 -1.442695, %v469_v60 }
 0x385   :  { %1539 = vpow2.f32 %v1244_v61 }
 0x386   :  { %1541 = vpow2.f32 %v1243_v62 }
 0x38f   :  { %v1540_v63 = vpop.eup %1539 }
 0x390   :  { %v1542_v0 = vpop.eup %1541  ;;  %v478_v1 = vadd.f32 1.0, %v1540_v63 }
 0x391   :  { %v477_v2 = vadd.f32 1.0, %v1542_v0 }
 0x392   :  { %1543 = vrcp.f32 %v478_v1 }
 0x393   :  { %1545 = vrcp.f32 %v477_v2 }
 0x39c   :  { %v1544_v6 = vpop.eup %1543 }
 0x39d   :  { %v1546_v8 = vpop.eup %1545  ;;  %v492_v9 = vmul.f32 %v1544_v6, %v488_v3 }
 0x39e   :  { %v491_v10 = vmul.f32 %v1546_v8, %v486_v4 }
 0x39f   :  { %497 = vrot.lane.b32.xlu0 %v492_v9, %s1597_s3 }
 0x3a0   :  { %495 = vrot.lane.b32.xlu1 %v491_v10, %s1597_s3 }
 0x411   :  { %v498_v11 = vpop.permute.xlu0 %497 }
 0x412   :  { %v502_v12 = vadd.f32 %v498_v11, %v387_v56  ;;  %v496_v13 = vpop.permute.xlu1 %495 }
 0x413   :  { %v501_v14 = vadd.f32 %v496_v13, %v382_v58 }
 0x414   :  { %1547 = vtanh.f32 %v502_v12 }
 0x415   :  { %1549 = vtanh.f32 %v501_v14 }
 0x41e   :  { %v1548_v15 = vpop.eup %1547 }
 0x41f   :  { %v1550_v16 = vpop.eup %1549  ;;  %509 = vrot.lane.b32.xlu0 %v1548_v15, %s1597_s3 }
 0x420   :  { %507 = vrot.lane.b32.xlu1 %v1550_v16, %s1597_s3 }
 0x491   :  { %v510_v17 = vpop.permute.xlu0 %509 }
 0x492   :  { %v514_v18 = vsub.f32 %v1642_v7, %v510_v17  ;;  %v508_v19 = vpop.permute.xlu1 %507  ;;  %v1468_v7 = vpack.c.bf16 %v601_v22, %v600_v21 }
 0x493   :  { %v513_v20 = vsub.f32 %v1635_v5, %v508_v19  ;;  %v603_v5 = vld [vmem:[%s1866_s1 + $0xa0] sm:$0xff] }
 0x494   :  { %519 = vrot.lane.b32.xlu0 %v514_v18, %s1596_s28  ;;  %v1472_v24 = vpack.c.bf16 %v603_v5, %v602_v23  ;;  %1469 = vmatprep.subr.bf16.mxu1 %v1468_v7 }
 0x495   :  { %517 = vrot.lane.b32.xlu1 %v513_v20, %s1596_s28  ;;  %1471 = vmatpush3.bf16.msra.mxu1 %v1468_v7 }
 0x496   :  { %1473 = vmatprep.subr.bf16.mxu1 %v1472_v24 }
 0x499   :  { %1475 = vmatpush3.bf16.msra.mxu1 %v1472_v24 }
 0x506   :  { %v520_v25 = vpop.permute.xlu0 %519 }
 0x507   :  { %v524_v26 = vmul.f32 %v1544_v6, %v520_v25  ;;  %v518_v27 = vpop.permute.xlu1 %517 }
 0x508   :  { %v523_v28 = vmul.f32 %v1546_v8, %v518_v27 }
 0x509   :  { %529 = vrot.lane.b32.xlu0 %v524_v26, %s1596_s28 }
 0x50a   :  { %527 = vrot.lane.b32.xlu1 %v523_v28, %s1596_s28 }
 0x57b   :  { %v530_v29 = vpop.permute.xlu0 %529 }
 0x57c   :  { %v1740_v30 = vadd.f32 %v1548_v15, %v530_v29  ;;  %v528_v31 = vpop.permute.xlu1 %527 }
 0x57d   :  { %v1742_v32 = vadd.f32 %v1550_v16, %v528_v31 }
 0x57e   :  { %541 = vrot.lane.b32.xlu0 %v1740_v30, %s1597_s3 }
 0x57f   :  { %539 = vrot.lane.b32.xlu1 %v1742_v32, %s1597_s3 }
 0x5f0   :  { %v1750_v34 = vpop.permute.xlu0 %541 }
 0x5f1   :  { %v1748_v33 = vpop.permute.xlu1 %539 }
 0x5f2   :  { %1386 = vmatprep.mubr.msk.f32.mxu1 %vm41_vm0, %v1748_v33 }
 0x5f3   :  { %1387 = vmatmul.mubr.msk.f32.vlgmr.msra.gmra.mrb[6].mxu1 %vm41_vm0, %v1750_v34 }
 0x6c6   :  { %v1388_v36 = vpop.f32.mrb[6].mxu1 }
 0x6c7   :  { %v687_v37 = vadd.f32 %v1388_v36, %v1247_v35  ;;  %v681_v38 = vpop.f32.mrb[7].mxu1 }
 0x6c8   :  { %v682_v39 = vadd.f32 %v1247_v35, %v681_v38 }
 0x6ca   :  { %1393 = vmatprep.mubr.msk.f32.mxu0 %vm123_vm1, %v682_v39  ;;  %v1760_v40 = vpack.i.bf16 %v687_v37, %v682_v39 }
 0x6cc   :  { %1520 = vrot.lane.b32.xlu1 %v1760_v40, %s1595_s25 }
 0x73e   :  { %v1521_v41 = vpop.permute.xlu1 %1520 }
 0x73f   :  { %v1523_v42 = vunpack.i.h.bf16 %v1521_v41  ;;  %v1522_v43 = vunpack.i.l.bf16 %v1521_v41 }
 0x741   :  { %v1476_v45 = vpack.c.bf16 %v1523_v42, %v1522_v43 }
 0x743   :  { %1478 = vmatprep.subr.msk.bf16.mxu0 %vm1766_vm3, %v1476_v45 }
 0x744   :  { %1481 = vmatpush3.bf16.xpose.msk.msra.mxu0 %vm1766_vm3, %v1476_v45 }
 0x74b   :  { %1394 = vmatmul.mubr.msk.f32.vlgmr.msra.gmra.mrb[4].mxu0 %vm123_vm1, %v687_v37 }
 0x81e   :  { %v1395_v48 = vpop.f32.mrb[4].mxu0 }
 0x81f   :  { %v776_v49 = vadd.f32 %v1395_v48, %v606_v46  ;;  %v770_v50 = vpop.f32.mrb[5].mxu0  ;;  %v1098_v48 = vld [vmem:[%s1866_s1 + $0xa8] sm:$0xff] }
 0x820   :  { %v771_v51 = vadd.f32 %v770_v50, %v605_v47  ;;  %v1100_v50 = vld [vmem:[%s1866_s1 + $0xb8] sm:$0xff] }
 0x821   :  { %v782_v52 = vsel %vm123_vm1, %v776_v49, -inf }
 0x822   :  { %783 = vmax.xlane.f32.xlu1 %v782_v52  ;;  %v779_v53 = vsel %vm123_vm1, %v771_v51, -inf  ;;  %v1101_v52 = vld [vmem:[%s1866_s1 + $0xc0] sm:$0xff] }
 0x823   :  { %780 = vmax.xlane.f32.xlu0 %v779_v53  ;;  %v1500_v53 = vpack.c.bf16 %v1101_v52, %v1100_v50 }
 0x833   :  { %1525 = vrot.lane.b32.xlu1 %v1760_v40, %s1597_s3 }
 0x837   :  { %888 = vrot.lane.b32.xlu1 %v682_v39, %s1598_s18 }
 0x83b   :  { %890 = vrot.lane.b32.xlu1 %v687_v37, %s1598_s18 }
 0x8af   :  { %v784_v54 = vpop.xlane.xlu1 %783 }
 0x8b0   :  { %v786_v55 = vsub.f32 %v776_v49, %v784_v54  ;;  %v781_v56 = vpop.xlane.xlu0 %780  ;;  %v1099_v49 = vld [vmem:[%s1866_s1 + $0xb0] sm:$0xff] }
 0x8b1   :  { %v785_v57 = vsub.f32 %v771_v51, %v781_v56  ;;  %v1496_v51 = vpack.c.bf16 %v1099_v49, %v1098_v48  ;;  %v548_v56 = vsel %vm41_vm0, %v1750_v34, 0.0 }
 0x8b2   :  { %v789_v58 = vmul.f32 1.442695, %v786_v55 }
 0x8b3   :  { %v787_v59 = vmul.f32 1.442695, %v785_v57  ;;  %v1526_v60 = vpop.permute.xlu1 %1525  ;;  %1497 = vmatprep.subr.bf16.mxu0 %v1496_v51  ;;  %v545_v57 = vsel %vm41_vm0, %v1748_v33, 0.0 }
 0x8b4   :  { %1551 = vpow2.f32 %v789_v58  ;;  %v1528_v61 = vunpack.i.h.bf16 %v1526_v60  ;;  %v1527_v62 = vunpack.i.l.bf16 %v1526_v60  ;;  %1499 = vmatpush3.bf16.msra.mxu0 %v1496_v51 }
 0x8b5   :  { %1553 = vpow2.f32 %v787_v59  ;;  %1501 = vmatprep.subr.bf16.mxu0 %v1500_v53 }
 0x8b6   :  { %v1482_v63 = vpack.c.bf16 %v1528_v61, %v1527_v62 }
 0x8b7   :  { %v889_v16 = vpop.permute.xlu1 %888 }
 0x8b8   :  { %1483 = vmatprep.subr.bf16.mxu1 %v1482_v63  ;;  %1503 = vmatpush3.bf16.msra.mxu0 %v1500_v53 }
 0x8b9   :  { %1485 = vmatpush3.bf16.msra.mxu1 %v1482_v63 }
 0x8bb   :  { %v891_v17 = vpop.permute.xlu1 %890 }
 0x8be   :  { %v1552_v0 = vpop.eup %1551 }
 0x8bf   :  { %v794_v1 = vsel %vm123_vm1, %v1552_v0, 0.0  ;;  %v1554_v2 = vpop.eup %1553 }
 0x8c0   :  { %795 = vadd.xlane.f32.xlu0 %v794_v1  ;;  %v791_v3 = vsel %vm123_vm1, %v1554_v2, 0.0 }
 0x8c4   :  { %792 = vadd.xlane.f32.xlu0 %v791_v3 }
 0x8da   :  { %1530 = vrot.lane.b32.xlu0 %v1760_v40, %s1599_s19 }
 0x94d   :  { %v796_v4 = vpop.xlane.xlu0 %795 }
 0x94e   :  { %1555 = vrcp.f32 %v796_v4 }
 0x951   :  { %v793_v6 = vpop.xlane.xlu0 %792 }
 0x952   :  { %1557 = vrcp.f32 %v793_v6 }
 0x955   :  { %v1531_v8 = vpop.permute.xlu0 %1530 }
 0x956   :  { %v1533_v9 = vunpack.i.h.bf16 %v1531_v8  ;;  %v1532_v10 = vunpack.i.l.bf16 %v1531_v8 }
 0x958   :  { %v1486_v11 = vpack.c.bf16 %v1533_v9, %v1532_v10  ;;  %v1556_v12 = vpop.eup %1555 }
 0x959   :  { %v800_v15 = vmul.f32 %v1556_v12, %v1552_v0  ;;  %v1264_v12 = vld [vmem:[%s1866_s1 + $0x6] ss:$0 sm:$0xff] }
 0x95a   :  { %1488 = vmatprep.subr.msk.bf16.mxu1 %vm1766_vm3, %v1486_v11 }
 0x95c   :  { %v1558_v13 = vpop.eup %1557 }
 0x95d   :  { %v799_v14 = vmul.f32 %v1558_v13, %v1554_v2 }
 0x95f   :  { %1400 = vmatprep.mubr.msk.f32.mxu1 %vm123_vm1, %v799_v14 }
 0x960   :  { %1401 = vmatmul.mubr.msk.f32.vlgmr.msra.gmra.mrb[8].mxu1 %vm123_vm1, %v800_v15 }
 0x961   :  { %1491 = vmatpush3.bf16.xpose.msk.msra.mxu1 %vm1766_vm3, %v1486_v11  ;;  %1407 = vmatprep.mubr.msk.f32.mxu1 %vm123_vm1, %v889_v16 }
 0x968   :  { %1408 = vmatmul.mubr.msk.f32.vlgmr.msra.gmra.mrb[10].mxu1 %vm123_vm1, %v891_v17 }
 0xa33   :  { %v1796_v18 = vpop.f32.mrb[8].mxu1 }
 0xa34   :  { %v1798_v19 = vpop.f32.mrb[9].mxu1 }
 0xa3b   :  { %v1409_v20 = vpop.f32.mrb[10].mxu1 }
 0xa3c   :  { %v976_v21 = vadd.f32 %v1409_v20, %v606_v46  ;;  %v970_v22 = vpop.f32.mrb[11].mxu1 }
 0xa3d   :  { %v971_v23 = vadd.f32 %v970_v22, %v605_v47 }
 0xa3e   :  { %v982_v7 = vsel %vm123_vm1, %v976_v21, -inf }
 0xa3f   :  { %983 = vmax.xlane.f32.xlu1 %v982_v7  ;;  %v979_v5 = vsel %vm123_vm1, %v971_v23, -inf }
 0xa40   :  { %980 = vmax.xlane.f32.xlu0 %v979_v5 }
 0xa50   :  { %1535 = vrot.lane.b32.xlu1 %v1760_v40, %s1600_s20 }
 0xacc   :  { %v984_v24 = vpop.xlane.xlu1 %983 }
 0xacd   :  { %v986_v25 = vsub.f32 %v976_v21, %v984_v24  ;;  %v981_v26 = vpop.xlane.xlu0 %980 }
 0xace   :  { %v985_v27 = vsub.f32 %v971_v23, %v981_v26 }
 0xacf   :  { %v989_v28 = vmul.f32 1.442695, %v986_v25 }
 0xad0   :  { %v987_v29 = vmul.f32 1.442695, %v985_v27  ;;  %v1536_v31 = vpop.permute.xlu1 %1535 }
 0xad1   :  { %v1538_v35 = vunpack.i.h.bf16 %v1536_v31  ;;  %v1537_v36 = vunpack.i.l.bf16 %v1536_v31 }
 0xad2   :  { %1559 = vpow2.f32 %v987_v29 }
 0xad3   :  { %v1492_v37 = vpack.c.bf16 %v1538_v35, %v1537_v36  ;;  %1561 = vpow2.f32 %v989_v28 }
 0xad5   :  { %1493 = vmatprep.subr.bf16.mxu1 %v1492_v37 }
 0xad6   :  { %1495 = vmatpush3.bf16.msra.mxu1 %v1492_v37 }
 0xadc   :  { %v1560_v38 = vpop.eup %1559 }
 0xadd   :  { %v991_v39 = vsel %vm123_vm1, %v1560_v38, 0.0  ;;  %v1562_v41 = vpop.eup %1561 }
 0xade   :  { %992 = vadd.xlane.f32.xlu0 %v991_v39  ;;  %v994_v40 = vsel %vm123_vm1, %v1562_v41, 0.0 }
 0xae2   :  { %995 = vadd.xlane.f32.xlu0 %v994_v40 }
 0xb6b   :  { %v993_v42 = vpop.xlane.xlu0 %992 }
 0xb6c   :  { %1563 = vrcp.f32 %v993_v42 }
 0xb6f   :  { %v996_v43 = vpop.xlane.xlu0 %995 }
 0xb70   :  { %1565 = vrcp.f32 %v996_v43 }
 0xb76   :  { %v1564_v44 = vpop.eup %1563 }
 0xb77   :  { %v999_v45 = vmul.f32 %v1564_v44, %v1560_v38 }
 0xb79   :  { %1414 = vmatprep.mubr.msk.f32.mxu1 %vm123_vm1, %v999_v45 }
 0xb7a   :  { %v1566_v46 = vpop.eup %1565 }
 0xb7b   :  { %v1000_v47 = vmul.f32 %v1566_v46, %v1562_v41 }
 0xb7d   :  { %1415 = vmatmul.mubr.msk.f32.vlgmr.msra.gmra.mrb[12].mxu1 %vm123_vm1, %v1000_v47 }
 0xc50   :  { %v1416_v54 = vpop.f32.mrb[12].mxu1 }
 0xc51   :  { %1092 = vrot.lane.b32.xlu1 %v1416_v54, %s1601_s30  ;;  %v1079_v55 = vpop.f32.mrb[13].mxu1 }
 0xc52   :  { %1090 = vrot.lane.b32.xlu0 %v1079_v55, %s1601_s30 }
 0xc71   :  { %549 = vadd.xlane.f32.xlu0 %v548_v56 }
 0xc75   :  { %546 = vadd.xlane.f32.xlu1 %v545_v57 }
 0xcc3   :  { %v1093_v58 = vpop.permute.xlu1 %1092 }
 0xcc4   :  { %v1091_v59 = vpop.permute.xlu0 %1090  ;;  %v1097_v61 = vsel %vm123_vm1, %v1796_v18, %v1093_v58 }
 0xcc5   :  { %v1096_v60 = vsel %vm123_vm1, %v1798_v19, %v1091_v59 }
 0xcc6   :  { %1425 = vmatprep.mubr.msk.f32.mxu0 %vm41_vm0, %v1096_v60 }
 0xcc7   :  { %1426 = vmatmul.mubr.msk.f32.vlgmr.msra.gmra.mrb[6].mxu0 %vm41_vm0, %v1097_v61 }
 0xcfe   :  { %v550_v62 = vpop.xlane.xlu0 %549 }
 0xcff   :  { %v553_v63 = vmul.f32 0.03125, %v550_v62 }
 0xd01   :  { %v555_v34 = vsub.f32 %v1740_v30, %v553_v63  ;;  %v1246_v30 = vld [vmem:[%s1866_s1 + $0x4] ss:$0 sm:$0xff] }
 0xd02   :  { %v547_v0 = vpop.xlane.xlu1 %546 }
 0xd03   :  { %v552_v1 = vmul.f32 0.03125, %v547_v0  ;;  %v557_v33 = vmul.f32 %v555_v34, %v555_v34 }
 0xd05   :  { %v554_v2 = vsub.f32 %v1742_v32, %v552_v1  ;;  %562 = vrot.lane.b32.xlu1 %v557_v33, %s1597_s3  ;;  %v1245_v32 = vld [vmem:[%s1866_s1 + $0x3] ss:$0 sm:$0xff]  ;;  %s1602_s1 = smov [#allocation2]  }
 0xd06   :  { %s1219_s10 = sshll.u32 %s1602_s1, 4  ;;  %s1220_s10 = int_to_ptr.vmem [resolvable:$true] %s1219_s10 }
 0xd07   :  { %v556_v3 = vmul.f32 %v554_v2, %v554_v2  ;;  %s1571_s0 = scalar_lea.vmem %s1220_s10, 256  ;;  %p1576_p1 = scmp.lt.s32.totalorder %s1220_s10, %s1220_s10 }
 0xd08   :  { %p1572_p0 = scmp.ne.s32.totalorder %s1220_s10, %s1571_s0  ;;  %p1577_p2 = scmp.lt.s32.totalorder %s1571_s0, %s1571_s0 }
 0xd09   :  { %560 = vrot.lane.b32.xlu0 %v556_v3, %s1597_s3 }
 0xd0a   :  { %p1578_p3 = por %p1577_p2, %p1576_p1 }
 0xd0c   :  { %p1579_p4 = pnand %p1578_p3, %p1572_p0 }
 0xd77   :  { %v563_v4 = vpop.permute.xlu1 %562 }
 0xd78   :  { %v569_v6 = vsel %vm41_vm0, %v563_v4, 0.0 }
 0xd79   :  { %570 = vadd.xlane.f32.xlu0 %v569_v6 }
 0xd7b   :  { %v561_v8 = vpop.permute.xlu0 %560 }
 0xd7c   :  { %v566_v9 = vsel %vm41_vm0, %v561_v8, 0.0 }
 0xd7d   :  { %567 = vadd.xlane.f32.xlu1 %v566_v9 }
 0xd8e   :  { %595 = vrot.lane.b32.xlu1 %v1246_v30, %s1597_s3 }
 0xd8f   :  { %585 = vrot.lane.b32.xlu0 %v1245_v32, %s1597_s3 }
 0xd9a   :  { %v1427_v10 = vpop.f32.mrb[6].mxu0 }
 0xd9b   :  { %v1175_v11 = vpop.f32.mrb[7].mxu0  ;;  %1188 = vrot.lane.b32.xlu0 %v1427_v10, %s1597_s3 }
 0xd9c   :  { %1186 = vrot.lane.b32.xlu1 %v1175_v11, %s1597_s3 }
 0xda0   :  { %1199 = vrot.lane.b32.xlu1 %v1264_v12, %s1597_s3 }
 0xe06   :  { %v571_v13 = vpop.xlane.xlu0 %570 }
 0xe07   :  { %v573_v14 = vmul.f32 0.03125, %v571_v13 }
 0xe09   :  { %v575_v15 = vadd.f32 1e-05, %v573_v14 }
 0xe0a   :  { %v568_v16 = vpop.xlane.xlu1 %567  ;;  %v586_v21 = vpop.permute.xlu0 %585 }
 0xe0b   :  { %1567 = vrsqrt.f32 %v575_v15  ;;  %v572_v17 = vmul.f32 0.03125, %v568_v16 }
 0xe0d   :  { %v574_v18 = vadd.f32 1e-05, %v572_v17 }
 0xe0e   :  { %v596_v19 = vpop.permute.xlu1 %595  ;;  %v1189_v26 = vpop.permute.xlu0 %1188 }
 0xe0f   :  { %1569 = vrsqrt.f32 %v574_v18 }
 0xe12   :  { %v1187_v23 = vpop.permute.xlu1 %1186 }
 0xe15   :  { %v1568_v20 = vpop.eup %1567 }
 0xe16   :  { %v579_v22 = vmul.f32 %v1568_v20, %v555_v34  ;;  %v1200_v27 = vpop.permute.xlu1 %1199 }
 0xe18   :  { %v589_v7 = vmul.f32 %v586_v21, %v579_v22 }
 0xe19   :  { %v1570_v5 = vpop.eup %1569 }
 0xe1a   :  { %v578_v24 = vmul.f32 %v1570_v5, %v554_v2  ;;  %v599_v25 = vadd.f32 %v596_v19, %v589_v7 }
 0xe1c   :  { %v588_v28 = vmul.f32 %v586_v21, %v578_v24  ;;  %v1193_v29 = vadd.f32 %v1189_v26, %v599_v25 }
 0xe1e   :  { %v598_v31 = vadd.f32 %v596_v19, %v588_v28  ;;  %v1203_v35 = vadd.f32 %v1200_v27, %v1193_v29 }
 0xe20   :  { %v1192_v36 = vadd.f32 %v1187_v23, %v598_v31  ;;  %1208 = vrot.lane.b32.xlu1 %v1203_v35, %s1597_s3 }
 0xe22   :  { %v1202_v37 = vadd.f32 %v1200_v27, %v1192_v36 }
 0xe24   :  { %1206 = vrot.lane.b32.xlu0 %v1202_v37, %s1597_s3 }
 0xe92   :  { %v1209_v38 = vpop.permute.xlu1 %1208 }
 0xe93   :  { %1213 = vst.msk [vmem:[#allocation2 + $0x8] sm:$0xff] %vm41_vm0, %v1209_v38 }
 0xe96   :  { %v1207_v39 = vpop.permute.xlu0 %1206 }
 0xe97   :  { %1212 = vst.msk [vmem:[#allocation2] sm:$0xff] %vm41_vm0, %v1207_v39 }
 0xe98   :  { %1582 = shalt.err (!%p1579_p4)
}
 0xe99   :  { %s1583_s3 = scalar_lea.hbm %s1867_s2, 256 }
 0xe9a   :  { %p1584_p5 = scmp.ne.s32.totalorder %s1867_s2, %s1583_s3  ;;  %p1587_p6 = scmp.lt.u32.totalorder %s1583_s3, %s1867_s2 }
 0xe9c   :  { %p1589_p7 = pnand %p1587_p6, %p1584_p5 }
 0xe9e   :  { %1592 = shalt.err (!%p1589_p7)
}
 0xe9f   :  { %s1603_s16 = smov 128   ;;  %s1604_s17 = smov 8  }
 0xea0   :  { %1225 = dma.vmem_to_hbm [thread:$0]  %s1220_s10, 256, %s1867_s2, [#allocation3], %s1603_s16, %s1603_s16, %s1604_s17  }
 0xea1   :  { %1593 = dma.done.wait [#allocation3], 256  }
 0xea2   :  { %1594 = vsyncadd [#allocation3], 4294967040 }
 0xea3   :  { %1229 = vsyncpa [#allocation3], 1 }

</bundles_post_ra>
